<compile_context>
chip_gen: v6e
topology: v6e:2x2x1
jax: 0.10.0
libtpu: 0.0.40
codegen_flags: <defaults>
</compile_context>

<pallas_src>
import jax
import jax.numpy as jnp
from jax import lax
from jax.experimental import pallas as pl
from jax.experimental.pallas import tpu as pltpu


def _lstm_kernel(x_ref, wx_ref, wh_ref, b_ref, wp_ref, bp_ref, out_ref):
    """Full sequential LSTM recurrence + final linear head, all in VMEM.

    x_ref:  (T*B, 1)      time-major flattened input (row t*B+b = x[b, t])
    wx_ref: (1, 4H)       packed input->gate weights  [g|i|f|o], i/f/o cols *0.5
    wh_ref: (H, 4H)       packed hidden->gate weights [g|i|f|o], i/f/o cols *0.5
    b_ref:  (1, 4H)       packed gate biases,                   i/f/o cols *0.5
    wp_ref: (H, Cpad)     output projection, zero-padded to 128 lanes
    bp_ref: (1, Cpad)     output bias, zero-padded
    out_ref:(B, Cpad)     lane-dense logits block for the last time step
    """
    TB = x_ref.shape[0]
    H4 = wh_ref.shape[1]
    H = H4 // 4
    B = out_ref.shape[0]
    T = TB // B

    wh = wh_ref[...]                                   # (H, 4H), resident

    # --- (1) x->gate contribution hoisted out of the recurrence, on the VPU --
    # D == 1 makes the old jnp.dot an outer product: broadcast multiply-add
    # over the whole (T*B, 4H) slab (8 vregs at these sizes), no MXU involved.
    xg = x_ref[...] * wx_ref[...] + b_ref[...]         # (T*B, 4H)

    h = jnp.zeros((B, H), jnp.float32)
    c = jnp.zeros((B, H), jnp.float32)

    # --- Fully unrolled sequential recurrence over T --------------------------
    for t in range(T):
        # Static, sublane-aligned slice of the precomputed x-gate buffer.
        gates = xg[t * B:(t + 1) * B, :] + jnp.dot(
            h, wh, preferred_element_type=jnp.float32
        )                                              # (B, 4H)

        # --- (2) One full-width tanh per step; sigmoid recovered on the VPU --
        # i/f/o columns were pre-scaled by 0.5, so sigmoid(z) = 0.5*t + 0.5.
        t_all = jnp.tanh(gates)                        # EUP pass 1 (full width)
        sig = t_all * 0.5 + 0.5                        # VPU fused mul-add

        g = t_all[:, 0 * H:1 * H]
        i = sig[:, 1 * H:2 * H]
        f = sig[:, 2 * H:3 * H]
        o = sig[:, 3 * H:4 * H]

        c = g * i + c * f
        h = jnp.tanh(c) * o                            # EUP pass 2

    # --- (3) Lane-dense head: full-width (B, 128) unmasked store --------------
    out_ref[...] = (
        jnp.dot(h, wp_ref[...], preferred_element_type=jnp.float32)
        + bp_ref[...]
    )


def lstm_forward(x, params):
    """x: (B, T) float32 (input_dim = 1), returns (B, num_classes)."""
    wx, wh, b, wp, bp = params
    B, T = x.shape
    H = wh.shape[0]
    C = wp.shape[1]

    # xg row slices in the kernel assume f32 sublane-tile alignment.
    assert B % 8 == 0, "batch must be a multiple of the f32 sublane tile (8)"

    # Zero-runtime-cost parameter plumbing (outside the kernel):
    # (a) scale i/f/o gate columns by 0.5 so sigmoid folds into the full-width
    #     tanh inside the kernel: sigmoid(z) = 0.5*tanh(z/2) + 0.5.
    scale = jnp.concatenate(
        [jnp.ones((1, H), jnp.float32), jnp.full((1, 3 * H), 0.5, jnp.float32)],
        axis=1,
    )                                                  # (1, 4H)
    wx_s = (wx * scale).astype(jnp.float32)            # (1, 4H)
    wh_s = (wh * scale).astype(jnp.float32)            # (H, 4H)
    b_s = (b * scale).astype(jnp.float32)              # (1, 4H)

    # (b) lane-dense head: pad projection to a multiple of 128 output lanes.
    C_pad = ((C + 127) // 128) * 128
    wp_pad = jnp.zeros((H, C_pad), jnp.float32).at[:, :C].set(wp)
    bp_pad = jnp.zeros((1, C_pad), jnp.float32).at[:, :C].set(bp)

    # (c) time-major flattened x so the per-step access is a static row slice.
    x_flat = jnp.transpose(x, (1, 0)).reshape(T * B, 1).astype(jnp.float32)

    vmem = pl.BlockSpec(memory_space=pltpu.MemorySpace.VMEM)
    out = pl.pallas_call(
        _lstm_kernel,
        out_shape=jax.ShapeDtypeStruct((B, C_pad), jnp.float32),
        in_specs=[vmem] * 6,
        out_specs=vmem,
    )(x_flat, wx_s, wh_s, b_s, wp_pad, bp_pad)
    return out[:, :C]


# ---------------------------------------------------------------------------
# Deterministic parameter init (xavier-style, matching shapes of the module)
# ---------------------------------------------------------------------------
def init_params(key, input_dim, num_hidden, num_classes):
    kgx, kix, kfx, kox, kgh, kih, kfh, koh, kph = jax.random.split(key, 9)

    def xavier_normal(k, fan_out, fan_in):
        std = jnp.sqrt(2.0 / (fan_in + fan_out))
        return std * jax.random.normal(k, (fan_out, fan_in), jnp.float32)

    def xavier_uniform(k, fan_out, fan_in):
        lim = jnp.sqrt(6.0 / (fan_in + fan_out))
        return jax.random.uniform(k, (fan_out, fan_in), jnp.float32, -lim, lim)

    # PyTorch stores w_* as (H, D) / (H, H) and uses x @ w.T; we store the
    # transposed, gate-packed versions so the math is x @ Wx directly.
    w_gx = xavier_normal(kgx, num_hidden, input_dim)
    w_ix = xavier_normal(kix, num_hidden, input_dim)
    w_fx = xavier_normal(kfx, num_hidden, input_dim)
    w_ox = xavier_normal(kox, num_hidden, input_dim)
    w_gh = xavier_normal(kgh, num_hidden, num_hidden)
    w_ih = xavier_normal(kih, num_hidden, num_hidden)
    w_fh = xavier_normal(kfh, num_hidden, num_hidden)
    w_oh = xavier_normal(koh, num_hidden, num_hidden)
    w_ph = xavier_uniform(kph, num_classes, num_hidden)

    wx = jnp.concatenate([w_gx.T, w_ix.T, w_fx.T, w_ox.T], axis=1)  # (D, 4H)
    wh = jnp.concatenate([w_gh.T, w_ih.T, w_fh.T, w_oh.T], axis=1)  # (H, 4H)
    b = jnp.zeros((1, 4 * num_hidden), jnp.float32)  # zeros, as in _init_parameters
    wp = w_ph.T                                      # (H, C)
    bp = jnp.zeros((1, num_classes), jnp.float32)
    return (wx, wh, b, wp, bp)


# Pure-JAX reference (mirrors the PyTorch forward, predict_half=False),
# using the canonical (unscaled) parameters.
def lstm_ref(x, params):
    wx, wh, b, wp, bp = params
    B = x.shape[0]
    H = wh.shape[0]

    def step(carry, x_t):
        h, c = carry
        gates = x_t @ wx + h @ wh + b
        g = jnp.tanh(gates[:, 0 * H:1 * H])
        i = jax.nn.sigmoid(gates[:, 1 * H:2 * H])
        f = jax.nn.sigmoid(gates[:, 2 * H:3 * H])
        o = jax.nn.sigmoid(gates[:, 3 * H:4 * H])
        c = g * i + c * f
        h = jnp.tanh(c) * o
        return (h, c), None

    x_tbd = jnp.transpose(x, (1, 0))[:, :, None]
    (h, _), _ = lax.scan(step, (jnp.zeros((B, H)), jnp.zeros((B, H))), x_tbd)
    return h @ wp + bp


if __name__ == "__main__":
    # Small shapes consistent with the module: input_dim=1 (x[:, [step]] is (B,1))
    batch_size = 8
    seq_length = 8
    input_dim = 1
    num_hidden = 32
    num_classes = 10

    key = jax.random.PRNGKey(0)
    kp, kx = jax.random.split(key)
    params = init_params(kp, input_dim, num_hidden, num_classes)
    x = jax.random.normal(kx, (batch_size, seq_length), jnp.float32)

    out = jax.block_until_ready(lstm_forward(x, params))
    ref = jax.block_until_ready(lstm_ref(x, params))

    assert out.shape == (batch_size, num_classes)
    assert jnp.allclose(out, ref, atol=1e-5, rtol=1e-5)
    print("KERNEL_OK")
</pallas_src>

<mosaic_0001>
module attributes {stable_mosaic.version = 11 : i64} {
  func.func @_lstm_kernel(%arg0: memref<64x1xf32, #tpu.memory_space<vmem>>, %arg1: memref<1x128xf32, #tpu.memory_space<vmem>>, %arg2: memref<32x128xf32, #tpu.memory_space<vmem>>, %arg3: memref<1x128xf32, #tpu.memory_space<vmem>>, %arg4: memref<32x128xf32, #tpu.memory_space<vmem>>, %arg5: memref<1x128xf32, #tpu.memory_space<vmem>>, %arg6: memref<8x128xf32, #tpu.memory_space<vmem>>) attributes {dimension_semantics = [], scalar_prefetch = 0 : i64, scratch_operands = 0 : i64, tpu.core_type = #tpu.core_type<tc>} {
    %c0 = arith.constant 0 : index
    %c0_0 = arith.constant 0 : index
    %0 = vector.load %arg2[%c0, %c0_0] : memref<32x128xf32, #tpu.memory_space<vmem>>, vector<32x128xf32>
    %c0_1 = arith.constant 0 : index
    %c0_2 = arith.constant 0 : index
    %1 = vector.load %arg0[%c0_1, %c0_2] : memref<64x1xf32, #tpu.memory_space<vmem>>, vector<64x1xf32>
    %c0_3 = arith.constant 0 : index
    %c0_4 = arith.constant 0 : index
    %2 = vector.load %arg1[%c0_3, %c0_4] : memref<1x128xf32, #tpu.memory_space<vmem>>, vector<1x128xf32>
    %3 = vector.broadcast %1 : vector<64x1xf32> to vector<64x128xf32>
    %4 = vector.broadcast %2 : vector<1x128xf32> to vector<64x128xf32>
    %5 = arith.mulf %3, %4 : vector<64x128xf32>
    %c0_5 = arith.constant 0 : index
    %c0_6 = arith.constant 0 : index
    %6 = vector.load %arg3[%c0_5, %c0_6] : memref<1x128xf32, #tpu.memory_space<vmem>>, vector<1x128xf32>
    %7 = vector.broadcast %6 : vector<1x128xf32> to vector<64x128xf32>
    %8 = arith.addf %5, %7 : vector<64x128xf32>
    %cst = arith.constant 0.000000e+00 : f32
    %9 = vector.broadcast %cst : f32 to vector<8x32xf32>
    %cst_7 = arith.constant 0.000000e+00 : f32
    %10 = vector.broadcast %cst_7 : f32 to vector<8x32xf32>
    %11 = vector.extract_strided_slice %8 {offsets = [0, 0], sizes = [8, 128], strides = [1, 1]} : vector<64x128xf32> to vector<8x128xf32>
    %cst_8 = arith.constant dense<0.000000e+00> : vector<8x128xf32>
    %12 = tpu.matmul %9, %0, %cst_8 {dimension_numbers = #tpu.dot_dimension_numbers<[1], [0], [0], [1], [0, 0, 1, 1], [], []>} : vector<8x32xf32>, vector<32x128xf32>, vector<8x128xf32> -> vector<8x128xf32>
    %13 = arith.addf %11, %12 : vector<8x128xf32>
    %14 = math.tanh %13 : vector<8x128xf32>
    %cst_9 = arith.constant 5.000000e-01 : f32
    %15 = vector.broadcast %cst_9 : f32 to vector<8x128xf32>
    %16 = arith.mulf %14, %15 : vector<8x128xf32>
    %cst_10 = arith.constant 5.000000e-01 : f32
    %17 = vector.broadcast %cst_10 : f32 to vector<8x128xf32>
    %18 = arith.addf %16, %17 : vector<8x128xf32>
    %19 = vector.extract_strided_slice %14 {offsets = [0, 0], sizes = [8, 32], strides = [1, 1]} : vector<8x128xf32> to vector<8x32xf32>
    %20 = vector.extract_strided_slice %18 {offsets = [0, 32], sizes = [8, 32], strides = [1, 1]} : vector<8x128xf32> to vector<8x32xf32>
    %21 = vector.extract_strided_slice %18 {offsets = [0, 64], sizes = [8, 32], strides = [1, 1]} : vector<8x128xf32> to vector<8x32xf32>
    %22 = vector.extract_strided_slice %18 {offsets = [0, 96], sizes = [8, 32], strides = [1, 1]} : vector<8x128xf32> to vector<8x32xf32>
    %23 = arith.mulf %19, %20 : vector<8x32xf32>
    %24 = arith.mulf %10, %21 : vector<8x32xf32>
    %25 = arith.addf %23, %24 : vector<8x32xf32>
    %26 = math.tanh %25 : vector<8x32xf32>
    %27 = arith.mulf %26, %22 : vector<8x32xf32>
    %28 = vector.extract_strided_slice %8 {offsets = [8, 0], sizes = [8, 128], strides = [1, 1]} : vector<64x128xf32> to vector<8x128xf32>
    %cst_11 = arith.constant dense<0.000000e+00> : vector<8x128xf32>
    %29 = tpu.matmul %27, %0, %cst_11 {dimension_numbers = #tpu.dot_dimension_numbers<[1], [0], [0], [1], [0, 0, 1, 1], [], []>} : vector<8x32xf32>, vector<32x128xf32>, vector<8x128xf32> -> vector<8x128xf32>
    %30 = arith.addf %28, %29 : vector<8x128xf32>
    %31 = math.tanh %30 : vector<8x128xf32>
    %cst_12 = arith.constant 5.000000e-01 : f32
    %32 = vector.broadcast %cst_12 : f32 to vector<8x128xf32>
    %33 = arith.mulf %31, %32 : vector<8x128xf32>
    %cst_13 = arith.constant 5.000000e-01 : f32
    %34 = vector.broadcast %cst_13 : f32 to vector<8x128xf32>
    %35 = arith.addf %33, %34 : vector<8x128xf32>
    %36 = vector.extract_strided_slice %31 {offsets = [0, 0], sizes = [8, 32], strides = [1, 1]} : vector<8x128xf32> to vector<8x32xf32>
    %37 = vector.extract_strided_slice %35 {offsets = [0, 32], sizes = [8, 32], strides = [1, 1]} : vector<8x128xf32> to vector<8x32xf32>
    %38 = vector.extract_strided_slice %35 {offsets = [0, 64], sizes = [8, 32], strides = [1, 1]} : vector<8x128xf32> to vector<8x32xf32>
    %39 = vector.extract_strided_slice %35 {offsets = [0, 96], sizes = [8, 32], strides = [1, 1]} : vector<8x128xf32> to vector<8x32xf32>
    %40 = arith.mulf %36, %37 : vector<8x32xf32>
    %41 = arith.mulf %25, %38 : vector<8x32xf32>
    %42 = arith.addf %40, %41 : vector<8x32xf32>
    %43 = math.tanh %42 : vector<8x32xf32>
    %44 = arith.mulf %43, %39 : vector<8x32xf32>
    %45 = vector.extract_strided_slice %8 {offsets = [16, 0], sizes = [8, 128], strides = [1, 1]} : vector<64x128xf32> to vector<8x128xf32>
    %cst_14 = arith.constant dense<0.000000e+00> : vector<8x128xf32>
    %46 = tpu.matmul %44, %0, %cst_14 {dimension_numbers = #tpu.dot_dimension_numbers<[1], [0], [0], [1], [0, 0, 1, 1], [], []>} : vector<8x32xf32>, vector<32x128xf32>, vector<8x128xf32> -> vector<8x128xf32>
    %47 = arith.addf %45, %46 : vector<8x128xf32>
    %48 = math.tanh %47 : vector<8x128xf32>
    %cst_15 = arith.constant 5.000000e-01 : f32
    %49 = vector.broadcast %cst_15 : f32 to vector<8x128xf32>
    %50 = arith.mulf %48, %49 : vector<8x128xf32>
    %cst_16 = arith.constant 5.000000e-01 : f32
    %51 = vector.broadcast %cst_16 : f32 to vector<8x128xf32>
    %52 = arith.addf %50, %51 : vector<8x128xf32>
    %53 = vector.extract_strided_slice %48 {offsets = [0, 0], sizes = [8, 32], strides = [1, 1]} : vector<8x128xf32> to vector<8x32xf32>
    %54 = vector.extract_strided_slice %52 {offsets = [0, 32], sizes = [8, 32], strides = [1, 1]} : vector<8x128xf32> to vector<8x32xf32>
    %55 = vector.extract_strided_slice %52 {offsets = [0, 64], sizes = [8, 32], strides = [1, 1]} : vector<8x128xf32> to vector<8x32xf32>
    %56 = vector.extract_strided_slice %52 {offsets = [0, 96], sizes = [8, 32], strides = [1, 1]} : vector<8x128xf32> to vector<8x32xf32>
    %57 = arith.mulf %53, %54 : vector<8x32xf32>
    %58 = arith.mulf %42, %55 : vector<8x32xf32>
    %59 = arith.addf %57, %58 : vector<8x32xf32>
    %60 = math.tanh %59 : vector<8x32xf32>
    %61 = arith.mulf %60, %56 : vector<8x32xf32>
    %62 = vector.extract_strided_slice %8 {offsets = [24, 0], sizes = [8, 128], strides = [1, 1]} : vector<64x128xf32> to vector<8x128xf32>
    %cst_17 = arith.constant dense<0.000000e+00> : vector<8x128xf32>
    %63 = tpu.matmul %61, %0, %cst_17 {dimension_numbers = #tpu.dot_dimension_numbers<[1], [0], [0], [1], [0, 0, 1, 1], [], []>} : vector<8x32xf32>, vector<32x128xf32>, vector<8x128xf32> -> vector<8x128xf32>
    %64 = arith.addf %62, %63 : vector<8x128xf32>
    %65 = math.tanh %64 : vector<8x128xf32>
    %cst_18 = arith.constant 5.000000e-01 : f32
    %66 = vector.broadcast %cst_18 : f32 to vector<8x128xf32>
    %67 = arith.mulf %65, %66 : vector<8x128xf32>
    %cst_19 = arith.constant 5.000000e-01 : f32
    %68 = vector.broadcast %cst_19 : f32 to vector<8x128xf32>
    %69 = arith.addf %67, %68 : vector<8x128xf32>
    %70 = vector.extract_strided_slice %65 {offsets = [0, 0], sizes = [8, 32], strides = [1, 1]} : vector<8x128xf32> to vector<8x32xf32>
    %71 = vector.extract_strided_slice %69 {offsets = [0, 32], sizes = [8, 32], strides = [1, 1]} : vector<8x128xf32> to vector<8x32xf32>
    %72 = vector.extract_strided_slice %69 {offsets = [0, 64], sizes = [8, 32], strides = [1, 1]} : vector<8x128xf32> to vector<8x32xf32>
    %73 = vector.extract_strided_slice %69 {offsets = [0, 96], sizes = [8, 32], strides = [1, 1]} : vector<8x128xf32> to vector<8x32xf32>
    %74 = arith.mulf %70, %71 : vector<8x32xf32>
    %75 = arith.mulf %59, %72 : vector<8x32xf32>
    %76 = arith.addf %74, %75 : vector<8x32xf32>
    %77 = math.tanh %76 : vector<8x32xf32>
    %78 = arith.mulf %77, %73 : vector<8x32xf32>
    %79 = vector.extract_strided_slice %8 {offsets = [32, 0], sizes = [8, 128], strides = [1, 1]} : vector<64x128xf32> to vector<8x128xf32>
    %cst_20 = arith.constant dense<0.000000e+00> : vector<8x128xf32>
    %80 = tpu.matmul %78, %0, %cst_20 {dimension_numbers = #tpu.dot_dimension_numbers<[1], [0], [0], [1], [0, 0, 1, 1], [], []>} : vector<8x32xf32>, vector<32x128xf32>, vector<8x128xf32> -> vector<8x128xf32>
    %81 = arith.addf %79, %80 : vector<8x128xf32>
    %82 = math.tanh %81 : vector<8x128xf32>
    %cst_21 = arith.constant 5.000000e-01 : f32
    %83 = vector.broadcast %cst_21 : f32 to vector<8x128xf32>
    %84 = arith.mulf %82, %83 : vector<8x128xf32>
    %cst_22 = arith.constant 5.000000e-01 : f32
    %85 = vector.broadcast %cst_22 : f32 to vector<8x128xf32>
    %86 = arith.addf %84, %85 : vector<8x128xf32>
    %87 = vector.extract_strided_slice %82 {offsets = [0, 0], sizes = [8, 32], strides = [1, 1]} : vector<8x128xf32> to vector<8x32xf32>
    %88 = vector.extract_strided_slice %86 {offsets = [0, 32], sizes = [8, 32], strides = [1, 1]} : vector<8x128xf32> to vector<8x32xf32>
    %89 = vector.extract_strided_slice %86 {offsets = [0, 64], sizes = [8, 32], strides = [1, 1]} : vector<8x128xf32> to vector<8x32xf32>
    %90 = vector.extract_strided_slice %86 {offsets = [0, 96], sizes = [8, 32], strides = [1, 1]} : vector<8x128xf32> to vector<8x32xf32>
    %91 = arith.mulf %87, %88 : vector<8x32xf32>
    %92 = arith.mulf %76, %89 : vector<8x32xf32>
    %93 = arith.addf %91, %92 : vector<8x32xf32>
    %94 = math.tanh %93 : vector<8x32xf32>
    %95 = arith.mulf %94, %90 : vector<8x32xf32>
    %96 = vector.extract_strided_slice %8 {offsets = [40, 0], sizes = [8, 128], strides = [1, 1]} : vector<64x128xf32> to vector<8x128xf32>
    %cst_23 = arith.constant dense<0.000000e+00> : vector<8x128xf32>
    %97 = tpu.matmul %95, %0, %cst_23 {dimension_numbers = #tpu.dot_dimension_numbers<[1], [0], [0], [1], [0, 0, 1, 1], [], []>} : vector<8x32xf32>, vector<32x128xf32>, vector<8x128xf32> -> vector<8x128xf32>
    %98 = arith.addf %96, %97 : vector<8x128xf32>
    %99 = math.tanh %98 : vector<8x128xf32>
    %cst_24 = arith.constant 5.000000e-01 : f32
    %100 = vector.broadcast %cst_24 : f32 to vector<8x128xf32>
    %101 = arith.mulf %99, %100 : vector<8x128xf32>
    %cst_25 = arith.constant 5.000000e-01 : f32
    %102 = vector.broadcast %cst_25 : f32 to vector<8x128xf32>
    %103 = arith.addf %101, %102 : vector<8x128xf32>
    %104 = vector.extract_strided_slice %99 {offsets = [0, 0], sizes = [8, 32], strides = [1, 1]} : vector<8x128xf32> to vector<8x32xf32>
    %105 = vector.extract_strided_slice %103 {offsets = [0, 32], sizes = [8, 32], strides = [1, 1]} : vector<8x128xf32> to vector<8x32xf32>
    %106 = vector.extract_strided_slice %103 {offsets = [0, 64], sizes = [8, 32], strides = [1, 1]} : vector<8x128xf32> to vector<8x32xf32>
    %107 = vector.extract_strided_slice %103 {offsets = [0, 96], sizes = [8, 32], strides = [1, 1]} : vector<8x128xf32> to vector<8x32xf32>
    %108 = arith.mulf %104, %105 : vector<8x32xf32>
    %109 = arith.mulf %93, %106 : vector<8x32xf32>
    %110 = arith.addf %108, %109 : vector<8x32xf32>
    %111 = math.tanh %110 : vector<8x32xf32>
    %112 = arith.mulf %111, %107 : vector<8x32xf32>
    %113 = vector.extract_strided_slice %8 {offsets = [48, 0], sizes = [8, 128], strides = [1, 1]} : vector<64x128xf32> to vector<8x128xf32>
    %cst_26 = arith.constant dense<0.000000e+00> : vector<8x128xf32>
    %114 = tpu.matmul %112, %0, %cst_26 {dimension_numbers = #tpu.dot_dimension_numbers<[1], [0], [0], [1], [0, 0, 1, 1], [], []>} : vector<8x32xf32>, vector<32x128xf32>, vector<8x128xf32> -> vector<8x128xf32>
    %115 = arith.addf %113, %114 : vector<8x128xf32>
    %116 = math.tanh %115 : vector<8x128xf32>
    %cst_27 = arith.constant 5.000000e-01 : f32
    %117 = vector.broadcast %cst_27 : f32 to vector<8x128xf32>
    %118 = arith.mulf %116, %117 : vector<8x128xf32>
    %cst_28 = arith.constant 5.000000e-01 : f32
    %119 = vector.broadcast %cst_28 : f32 to vector<8x128xf32>
    %120 = arith.addf %118, %119 : vector<8x128xf32>
    %121 = vector.extract_strided_slice %116 {offsets = [0, 0], sizes = [8, 32], strides = [1, 1]} : vector<8x128xf32> to vector<8x32xf32>
    %122 = vector.extract_strided_slice %120 {offsets = [0, 32], sizes = [8, 32], strides = [1, 1]} : vector<8x128xf32> to vector<8x32xf32>
    %123 = vector.extract_strided_slice %120 {offsets = [0, 64], sizes = [8, 32], strides = [1, 1]} : vector<8x128xf32> to vector<8x32xf32>
    %124 = vector.extract_strided_slice %120 {offsets = [0, 96], sizes = [8, 32], strides = [1, 1]} : vector<8x128xf32> to vector<8x32xf32>
    %125 = arith.mulf %121, %122 : vector<8x32xf32>
    %126 = arith.mulf %110, %123 : vector<8x32xf32>
    %127 = arith.addf %125, %126 : vector<8x32xf32>
    %128 = math.tanh %127 : vector<8x32xf32>
    %129 = arith.mulf %128, %124 : vector<8x32xf32>
    %130 = vector.extract_strided_slice %8 {offsets = [56, 0], sizes = [8, 128], strides = [1, 1]} : vector<64x128xf32> to vector<8x128xf32>
    %cst_29 = arith.constant dense<0.000000e+00> : vector<8x128xf32>
    %131 = tpu.matmul %129, %0, %cst_29 {dimension_numbers = #tpu.dot_dimension_numbers<[1], [0], [0], [1], [0, 0, 1, 1], [], []>} : vector<8x32xf32>, vector<32x128xf32>, vector<8x128xf32> -> vector<8x128xf32>
    %132 = arith.addf %130, %131 : vector<8x128xf32>
    %133 = math.tanh %132 : vector<8x128xf32>
    %cst_30 = arith.constant 5.000000e-01 : f32
    %134 = vector.broadcast %cst_30 : f32 to vector<8x128xf32>
    %135 = arith.mulf %133, %134 : vector<8x128xf32>
    %cst_31 = arith.constant 5.000000e-01 : f32
    %136 = vector.broadcast %cst_31 : f32 to vector<8x128xf32>
    %137 = arith.addf %135, %136 : vector<8x128xf32>
    %138 = vector.extract_strided_slice %133 {offsets = [0, 0], sizes = [8, 32], strides = [1, 1]} : vector<8x128xf32> to vector<8x32xf32>
    %139 = vector.extract_strided_slice %137 {offsets = [0, 32], sizes = [8, 32], strides = [1, 1]} : vector<8x128xf32> to vector<8x32xf32>
    %140 = vector.extract_strided_slice %137 {offsets = [0, 64], sizes = [8, 32], strides = [1, 1]} : vector<8x128xf32> to vector<8x32xf32>
    %141 = vector.extract_strided_slice %137 {offsets = [0, 96], sizes = [8, 32], strides = [1, 1]} : vector<8x128xf32> to vector<8x32xf32>
    %142 = arith.mulf %138, %139 : vector<8x32xf32>
    %143 = arith.mulf %127, %140 : vector<8x32xf32>
    %144 = arith.addf %142, %143 : vector<8x32xf32>
    %145 = math.tanh %144 : vector<8x32xf32>
    %146 = arith.mulf %145, %141 : vector<8x32xf32>
    %c0_32 = arith.constant 0 : index
    %c0_33 = arith.constant 0 : index
    %147 = vector.load %arg4[%c0_32, %c0_33] : memref<32x128xf32, #tpu.memory_space<vmem>>, vector<32x128xf32>
    %cst_34 = arith.constant dense<0.000000e+00> : vector<8x128xf32>
    %148 = tpu.matmul %146, %147, %cst_34 {dimension_numbers = #tpu.dot_dimension_numbers<[1], [0], [0], [1], [0, 0, 1, 1], [], []>} : vector<8x32xf32>, vector<32x128xf32>, vector<8x128xf32> -> vector<8x128xf32>
    %c0_35 = arith.constant 0 : index
    %c0_36 = arith.constant 0 : index
    %149 = vector.load %arg5[%c0_35, %c0_36] : memref<1x128xf32, #tpu.memory_space<vmem>>, vector<1x128xf32>
    %150 = vector.broadcast %149 : vector<1x128xf32> to vector<8x128xf32>
    %151 = arith.addf %148, %150 : vector<8x128xf32>
    %c0_37 = arith.constant 0 : index
    %c0_38 = arith.constant 0 : index
    %152 = vector.load %arg6[%c0_37, %c0_38] : memref<8x128xf32, #tpu.memory_space<vmem>>, vector<8x128xf32>
    tpu.vector_store %arg6[%c0_37, %c0_38], %151 {strides = array<i32>} : memref<8x128xf32, #tpu.memory_space<vmem>>, vector<8x128xf32>,
    return
  }
}

</mosaic_0001>

<bundles_post_ra>
// kernel: tpu_custom_call.1
= control target key start
LH: loop header
LB: loop body
LE: loop exit
PB: predicated region body
PF: predicated region fallthrough
CT: control target
= control target key end

     0   :  { %v1160_v1 = vmov 0.0   ;;  %vm1161_vm0 = vmmov 0   ;;  %v1162_v4 = vmov 0   ;;  %s1409_s0 = inlined_call_operand.vmem [shape: f32[64,1], index: 0, kind: input, shape index: {}]   ;;  %s1410_s1 = inlined_call_operand.vmem [shape: f32[1,128], index: 1, kind: input, shape index: {}]   ;;  %s1411_s2 = inlined_call_operand.vmem [shape: f32[32,128], index: 2, kind: input, shape index: {}]   ;;  %s1412_s3 = inlined_call_operand.vmem [shape: f32[1,128], index: 3, kind: input, shape index: {}]   ;;  %s1413_s4 = inlined_call_operand.vmem [shape: f32[32,128], index: 4, kind: input, shape index: {}]   ;;  %s1414_s5 = inlined_call_operand.vmem [shape: f32[1,128], index: 5, kind: input, shape index: {}]   ;;  %s1415_s6 = inlined_call_operand.hbm [shape: f32[8,128], index: 6, kind: output, shape index: {}]  }
   0x1   :  { %v1205_v0 = vld [vmem:[%s1411_s2 + $0x18] sm:$0xff]  ;;  %999 = vmatprep.subr.mxu0 %v1160_v1  ;;  %v1211_v2 = vld [vmem:[%s1411_s2 + $0x10] sm:$0xff]  ;;  %1007 = vmatprep.mubr.msk.f32.mxu0 %vm1161_vm0, %v1160_v1  ;;  %v28_v3 = vld [vmem:[%s1409_s0] sm:$0xff] }
   0x2   :  { %1000 = vmatpush3.msra.mxu0 %v1205_v0  ;;  %1105 = vset.pattern.permute.xlu0 %v1162_v4 }
   0x3   :  { %11 = vsyncpa [#allocation3], 0  ;;  %1001 = vmatprep.subr.mxu0 %v1160_v1  ;;  %v1223_v5 = vld [vmem:[%s1411_s2 + $0x8] sm:$0xff]  ;;  %39 = vperm.xlu0 %1105, %v28_v3   ;;  %v1231_v6 = vld [vmem:[%s1411_s2] sm:$0xff]  ;;  %s1163_s10 = smov 96   ;;  %s1164_s12 = smov 64  }
   0x4   :  { %1002 = vmatpush3.msra.mxu0 %v1211_v2  ;;  %1010 = vmatprep.subr.mxu1 %v1160_v1  ;;  %v1261_v7 = vld [vmem:[%s1410_s1] ss:$0 sm:$0xff]  ;;  %v29_v19 = vld [vmem:[%s1409_s0 + $0x8] sm:$0xff]  ;;  %vm106_vm1 = vcmask 261120   ;;  %v30_v36 = vld [vmem:[%s1409_s0 + $0x10] sm:$0xff]  ;;  %s1166_s9 = smov [#allocation2]  }
   0x5   :  { %1003 = vmatprep.subr.mxu0 %v1160_v1  ;;  %1011 = vmatpush3.msra.mxu1 %v1205_v0  ;;  %v1267_v10 = vld [vmem:[%s1412_s3] ss:$0 sm:$0xff]  ;;  %s1165_s3 = smov 32   ;;  %v31_v54 = vld [vmem:[%s1409_s0 + $0x18] sm:$0xff] }
   0x6   :  { %1004 = vmatpush3.msra.mxu0 %v1223_v5  ;;  %1012 = vmatprep.subr.mxu1 %v1160_v1 }
   0x7   :  { %1005 = vmatprep.subr.mxu0 %v1160_v1  ;;  %1013 = vmatpush3.msra.mxu1 %v1211_v2 }
   0x8   :  { %1006 = vmatpush3.msra.mxu0 %v1231_v6  ;;  %1014 = vmatprep.subr.mxu1 %v1160_v1 }
   0x9   :  { %1008 = vmatmul.mubr.f32.vlgmr.msra.gmra.mxu0 %v1160_v1  ;;  %1015 = vmatpush3.msra.mxu1 %v1223_v5 }
   0xa   :  { %1016 = vmatprep.subr.mxu1 %v1160_v1  ;;  %1018 = vmatprep.mubr.msk.f32.mxu1 %vm1161_vm0, %v1160_v1 }
   0xb   :  { %1017 = vmatpush3.msra.mxu1 %v1231_v6  ;;  %1021 = vmatprep.subr.mxu0 %v1160_v1 }
   0xc   :  { %1022 = vmatpush3.msra.mxu0 %v1205_v0  ;;  %1029 = vmatprep.mubr.msk.f32.mxu0 %vm1161_vm0, %v1160_v1 }
   0xd   :  { %1023 = vmatprep.subr.mxu0 %v1160_v1  ;;  %1032 = vmatprep.subr.mxu1 %v1160_v1 }
   0xe   :  { %1024 = vmatpush3.msra.mxu0 %v1211_v2 }
   0xf   :  { %1025 = vmatprep.subr.mxu0 %v1160_v1 }
  0x10   :  { %1026 = vmatpush3.msra.mxu0 %v1223_v5 }
  0x11   :  { %1027 = vmatprep.subr.mxu0 %v1160_v1 }
  0x12   :  { %1028 = vmatpush3.msra.mxu0 %v1231_v6 }
  0x13   :  { %1043 = vmatprep.subr.mxu0 %v1160_v1 }
  0x7e   :  { %v40_v8 = vpop.permute.xlu0 %39 }
  0x7f   :  { %v83_v9 = vmul.f32 %v1261_v7, %v40_v8 }
  0x81   :  { %v98_v11 = vadd.f32 %v1267_v10, %v83_v9 }
  0xc9   :  { %v176_v12 = vpop.f32.mrf.mxu0 }
  0xca   :  { %v180_v13 = vadd.f32 %v176_v12, %v98_v11 }
  0xcb   :  { %v1009_v14 = vpop.f32.mrf.mxu0 }
  0xcc   :  { %1106 = vtanh.f32 %v180_v13 }
  0xd9   :  { %v1107_v15 = vpop.eup %1106 }
  0xda   :  { %v182_v16 = vmul.f32 0.5, %v1107_v15 }
  0xdc   :  { %v183_v17 = vadd.f32 0.5, %v182_v16 }
  0xde   :  { %185 = vrot.lane.b32.xlu0 %v183_v17, %s1163_s10  ;;  %v189_v18 = vmul.f32 0.0, %v183_v17 }
  0xe0   :  { %191 = vrot.lane.b32.xlu1 %v189_v18, %s1164_s12 }
  0xe2   :  { %44 = vperm.xlu0 %1105, %v29_v19  }
  0xe4   :  { %196 = vrot.lane.b32.xlu1 %v183_v17, %s1165_s3 }
 0x150   :  { %v186_v20 = vpop.permute.xlu0 %185 }
 0x151   :  { %v188_v21 = vmul.f32 %v1107_v15, %v186_v20  ;;  %v32_v15 = vld [vmem:[%s1409_s0 + $0x20] sm:$0xff] }
 0x152   :  { %v192_v22 = vpop.permute.xlu1 %191 }
 0x153   :  { %v194_v23 = vadd.f32 %v192_v22, %v188_v21 }
 0x155   :  { %1108 = vtanh.f32 %v194_v23 }
 0x156   :  { %v197_v25 = vpop.permute.xlu1 %196 }
 0x15d   :  { %v45_v27 = vpop.permute.xlu0 %44 }
 0x15e   :  { %v84_v28 = vmul.f32 %v1261_v7, %v45_v27 }
 0x160   :  { %v99_v29 = vadd.f32 %v1267_v10, %v84_v28 }
 0x162   :  { %v1109_v24 = vpop.eup %1108 }
 0x163   :  { %v199_v26 = vmul.f32 %v1109_v24, %v197_v25 }
 0x165   :  { %1019 = vmatmul.mubr.msk.f32.vlgmr.msra.gmra.mxu1 %vm106_vm1, %v199_v26 }
 0x166   :  { %1033 = vmatpush3.msra.mxu1 %v1205_v0  ;;  %1040 = vmatprep.mubr.msk.f32.mxu1 %vm1161_vm0, %v1160_v1 }
 0x167   :  { %1034 = vmatprep.subr.mxu1 %v1160_v1 }
 0x168   :  { %1035 = vmatpush3.msra.mxu1 %v1211_v2 }
 0x169   :  { %1036 = vmatprep.subr.mxu1 %v1160_v1 }
 0x16a   :  { %1037 = vmatpush3.msra.mxu1 %v1223_v5 }
 0x16b   :  { %1038 = vmatprep.subr.mxu1 %v1160_v1 }
 0x16c   :  { %1039 = vmatpush3.msra.mxu1 %v1231_v6 }
 0x16d   :  { %1054 = vmatprep.subr.mxu1 %v1160_v1 }
 0x225   :  { %v269_v30 = vpop.f32.mrf.mxu1 }
 0x226   :  { %v273_v31 = vadd.f32 %v269_v30, %v99_v29 }
 0x227   :  { %v1020_v32 = vpop.f32.mrf.mxu1 }
 0x228   :  { %1110 = vtanh.f32 %v273_v31 }
 0x235   :  { %v1111_v33 = vpop.eup %1110 }
 0x236   :  { %v275_v34 = vmul.f32 0.5, %v1111_v33 }
 0x238   :  { %v276_v35 = vadd.f32 0.5, %v275_v34 }
 0x23a   :  { %282 = vrot.lane.b32.xlu0 %v276_v35, %s1164_s12  ;;  %278 = vrot.lane.b32.xlu1 %v276_v35, %s1163_s10 }
 0x23e   :  { %49 = vperm.xlu0 %1105, %v30_v36   ;;  %288 = vrot.lane.b32.xlu1 %v276_v35, %s1165_s3 }
 0x2ac   :  { %v283_v37 = vpop.permute.xlu0 %282  ;;  %v279_v38 = vpop.permute.xlu1 %278 }
 0x2ad   :  { %v285_v39 = vmul.f32 %v283_v37, %v194_v23  ;;  %v281_v40 = vmul.f32 %v1111_v33, %v279_v38  ;;  %v33_v33 = vld [vmem:[%s1409_s0 + $0x28] sm:$0xff] }
 0x2af   :  { %v286_v41 = vadd.f32 %v285_v39, %v281_v40 }
 0x2b0   :  { %v289_v43 = vpop.permute.xlu1 %288 }
 0x2b1   :  { %1112 = vtanh.f32 %v286_v41 }
 0x2b9   :  { %v50_v45 = vpop.permute.xlu0 %49 }
 0x2ba   :  { %v85_v46 = vmul.f32 %v1261_v7, %v50_v45 }
 0x2bc   :  { %v100_v47 = vadd.f32 %v1267_v10, %v85_v46 }
 0x2be   :  { %v1113_v42 = vpop.eup %1112 }
 0x2bf   :  { %v291_v44 = vmul.f32 %v1113_v42, %v289_v43 }
 0x2c1   :  { %1030 = vmatmul.mubr.msk.f32.vlgmr.msra.gmra.mxu0 %vm106_vm1, %v291_v44 }
 0x2c2   :  { %1044 = vmatpush3.msra.mxu0 %v1205_v0  ;;  %1051 = vmatprep.mubr.msk.f32.mxu0 %vm1161_vm0, %v1160_v1 }
 0x2c3   :  { %1045 = vmatprep.subr.mxu0 %v1160_v1 }
 0x2c4   :  { %1046 = vmatpush3.msra.mxu0 %v1211_v2 }
 0x2c5   :  { %1047 = vmatprep.subr.mxu0 %v1160_v1 }
 0x2c6   :  { %1048 = vmatpush3.msra.mxu0 %v1223_v5 }
 0x2c7   :  { %1049 = vmatprep.subr.mxu0 %v1160_v1 }
 0x2c8   :  { %1050 = vmatpush3.msra.mxu0 %v1231_v6 }
 0x2c9   :  { %1065 = vmatprep.subr.mxu0 %v1160_v1 }
 0x381   :  { %v361_v48 = vpop.f32.mrf.mxu0 }
 0x382   :  { %v365_v49 = vadd.f32 %v361_v48, %v100_v47 }
 0x383   :  { %v1031_v50 = vpop.f32.mrf.mxu0 }
 0x384   :  { %1114 = vtanh.f32 %v365_v49 }
 0x391   :  { %v1115_v51 = vpop.eup %1114 }
 0x392   :  { %v367_v52 = vmul.f32 0.5, %v1115_v51 }
 0x394   :  { %v368_v53 = vadd.f32 0.5, %v367_v52 }
 0x396   :  { %374 = vrot.lane.b32.xlu0 %v368_v53, %s1164_s12  ;;  %370 = vrot.lane.b32.xlu1 %v368_v53, %s1163_s10 }
 0x39a   :  { %54 = vperm.xlu0 %1105, %v31_v54   ;;  %380 = vrot.lane.b32.xlu1 %v368_v53, %s1165_s3 }
 0x408   :  { %v375_v55 = vpop.permute.xlu0 %374  ;;  %v371_v56 = vpop.permute.xlu1 %370 }
 0x409   :  { %v377_v57 = vmul.f32 %v375_v55, %v286_v41  ;;  %v373_v58 = vmul.f32 %v1115_v51, %v371_v56 }
 0x40b   :  { %v378_v59 = vadd.f32 %v377_v57, %v373_v58 }
 0x40c   :  { %v381_v61 = vpop.permute.xlu1 %380 }
 0x40d   :  { %1116 = vtanh.f32 %v378_v59 }
 0x415   :  { %v55_v63 = vpop.permute.xlu0 %54 }
 0x416   :  { %v86_v3 = vmul.f32 %v1261_v7, %v55_v63 }
 0x418   :  { %v101_v4 = vadd.f32 %v1267_v10, %v86_v3 }
 0x41a   :  { %v1117_v60 = vpop.eup %1116 }
 0x41b   :  { %v383_v62 = vmul.f32 %v1117_v60, %v381_v61 }
 0x41d   :  { %1041 = vmatmul.mubr.msk.f32.vlgmr.msra.gmra.mxu1 %vm106_vm1, %v383_v62 }
 0x41e   :  { %1055 = vmatpush3.msra.mxu1 %v1205_v0  ;;  %1062 = vmatprep.mubr.msk.f32.mxu1 %vm1161_vm0, %v1160_v1 }
 0x41f   :  { %1056 = vmatprep.subr.mxu1 %v1160_v1 }
 0x420   :  { %1057 = vmatpush3.msra.mxu1 %v1211_v2 }
 0x421   :  { %1058 = vmatprep.subr.mxu1 %v1160_v1 }
 0x422   :  { %1059 = vmatpush3.msra.mxu1 %v1223_v5 }
 0x423   :  { %1060 = vmatprep.subr.mxu1 %v1160_v1 }
 0x424   :  { %1061 = vmatpush3.msra.mxu1 %v1231_v6 }
 0x425   :  { %1076 = vmatprep.subr.mxu1 %v1160_v1 }
 0x4dd   :  { %v453_v8 = vpop.f32.mrf.mxu1 }
 0x4de   :  { %v457_v9 = vadd.f32 %v453_v8, %v101_v4  ;;  %v35_v4 = vld [vmem:[%s1409_s0 + $0x38] sm:$0xff] }
 0x4df   :  { %v1042_v11 = vpop.f32.mrf.mxu1 }
 0x4e0   :  { %1118 = vtanh.f32 %v457_v9 }
 0x4ed   :  { %v1119_v12 = vpop.eup %1118 }
 0x4ee   :  { %v459_v13 = vmul.f32 0.5, %v1119_v12 }
 0x4f0   :  { %v460_v14 = vadd.f32 0.5, %v459_v13 }
 0x4f2   :  { %466 = vrot.lane.b32.xlu0 %v460_v14, %s1164_s12  ;;  %462 = vrot.lane.b32.xlu1 %v460_v14, %s1163_s10 }
 0x4f6   :  { %59 = vperm.xlu0 %1105, %v32_v15   ;;  %472 = vrot.lane.b32.xlu1 %v460_v14, %s1165_s3 }
 0x564   :  { %v467_v16 = vpop.permute.xlu0 %466  ;;  %v463_v17 = vpop.permute.xlu1 %462 }
 0x565   :  { %v469_v18 = vmul.f32 %v467_v16, %v378_v59  ;;  %v465_v19 = vmul.f32 %v1119_v12, %v463_v17 }
 0x567   :  { %v470_v20 = vadd.f32 %v469_v18, %v465_v19 }
 0x568   :  { %v473_v22 = vpop.permute.xlu1 %472 }
 0x569   :  { %1120 = vtanh.f32 %v470_v20 }
 0x571   :  { %v60_v24 = vpop.permute.xlu0 %59 }
 0x572   :  { %v87_v25 = vmul.f32 %v1261_v7, %v60_v24 }
 0x574   :  { %v102_v26 = vadd.f32 %v1267_v10, %v87_v25 }
 0x576   :  { %v1121_v21 = vpop.eup %1120 }
 0x577   :  { %v475_v23 = vmul.f32 %v1121_v21, %v473_v22 }
 0x579   :  { %1052 = vmatmul.mubr.msk.f32.vlgmr.msra.gmra.mxu0 %vm106_vm1, %v475_v23 }
 0x57a   :  { %1066 = vmatpush3.msra.mxu0 %v1205_v0  ;;  %1073 = vmatprep.mubr.msk.f32.mxu0 %vm1161_vm0, %v1160_v1 }
 0x57b   :  { %1067 = vmatprep.subr.mxu0 %v1160_v1 }
 0x57c   :  { %1068 = vmatpush3.msra.mxu0 %v1211_v2 }
 0x57d   :  { %1069 = vmatprep.subr.mxu0 %v1160_v1 }
 0x57e   :  { %1070 = vmatpush3.msra.mxu0 %v1223_v5 }
 0x57f   :  { %1071 = vmatprep.subr.mxu0 %v1160_v1 }
 0x580   :  { %1072 = vmatpush3.msra.mxu0 %v1231_v6 }
 0x581   :  { %1087 = vmatprep.subr.mxu0 %v1160_v1 }
 0x639   :  { %v545_v27 = vpop.f32.mrf.mxu0 }
 0x63a   :  { %v549_v28 = vadd.f32 %v545_v27, %v102_v26  ;;  %v847_v26 = vld [vmem:[%s1413_s4 + $0x18] sm:$0xff]  ;;  %v844_v27 = vld [vmem:[%s1413_s4] sm:$0xff] }
 0x63b   :  { %v1053_v29 = vpop.f32.mrf.mxu0 }
 0x63c   :  { %1122 = vtanh.f32 %v549_v28 }
 0x649   :  { %v1123_v30 = vpop.eup %1122 }
 0x64a   :  { %v551_v31 = vmul.f32 0.5, %v1123_v30 }
 0x64c   :  { %v552_v32 = vadd.f32 0.5, %v551_v31 }
 0x64e   :  { %558 = vrot.lane.b32.xlu0 %v552_v32, %s1164_s12  ;;  %554 = vrot.lane.b32.xlu1 %v552_v32, %s1163_s10 }
 0x652   :  { %64 = vperm.xlu0 %1105, %v33_v33   ;;  %564 = vrot.lane.b32.xlu1 %v552_v32, %s1165_s3 }
 0x6c0   :  { %v559_v34 = vpop.permute.xlu0 %558  ;;  %v555_v35 = vpop.permute.xlu1 %554 }
 0x6c1   :  { %v561_v36 = vmul.f32 %v559_v34, %v470_v20  ;;  %v557_v37 = vmul.f32 %v1123_v30, %v555_v35 }
 0x6c3   :  { %v562_v38 = vadd.f32 %v561_v36, %v557_v37  ;;  %v952_v36 = vld [vmem:[%s1414_s5] ss:$0 sm:$0xff] }
 0x6c4   :  { %v565_v40 = vpop.permute.xlu1 %564 }
 0x6c5   :  { %1124 = vtanh.f32 %v562_v38 }
 0x6cd   :  { %v65_v42 = vpop.permute.xlu0 %64 }
 0x6ce   :  { %v88_v43 = vmul.f32 %v1261_v7, %v65_v42 }
 0x6d2   :  { %v1125_v39 = vpop.eup %1124 }
 0x6d3   :  { %v567_v41 = vmul.f32 %v1125_v39, %v565_v40 }
 0x6d5   :  { %1063 = vmatmul.mubr.msk.f32.vlgmr.msra.gmra.mxu1 %vm106_vm1, %v567_v41 }
 0x6d6   :  { %1077 = vmatpush3.msra.mxu1 %v1205_v0  ;;  %1084 = vmatprep.mubr.msk.f32.mxu1 %vm1161_vm0, %v1160_v1  ;;  %v103_v0 = vadd.f32 %v1267_v10, %v88_v43 }
 0x6d7   :  { %1078 = vmatprep.subr.mxu1 %v1160_v1 }
 0x6d8   :  { %1079 = vmatpush3.msra.mxu1 %v1211_v2 }
 0x6d9   :  { %1080 = vmatprep.subr.mxu1 %v1160_v1 }
 0x6da   :  { %1081 = vmatpush3.msra.mxu1 %v1223_v5  ;;  %v34_v5 = vld [vmem:[%s1409_s0 + $0x30] sm:$0xff] }
 0x6db   :  { %1082 = vmatprep.subr.mxu1 %v1160_v1 }
 0x6dc   :  { %1083 = vmatpush3.msra.mxu1 %v1231_v6 }
 0x795   :  { %v637_v44 = vpop.f32.mrf.mxu1 }
 0x796   :  { %v641_v45 = vadd.f32 %v637_v44, %v103_v0 }
 0x797   :  { %v1064_v46 = vpop.f32.mrf.mxu1 }
 0x798   :  { %1126 = vtanh.f32 %v641_v45 }
 0x7a5   :  { %v1127_v47 = vpop.eup %1126 }
 0x7a6   :  { %v643_v48 = vmul.f32 0.5, %v1127_v47 }
 0x7a8   :  { %v644_v2 = vadd.f32 0.5, %v643_v48 }
 0x7aa   :  { %650 = vrot.lane.b32.xlu0 %v644_v2, %s1164_s12  ;;  %646 = vrot.lane.b32.xlu1 %v644_v2, %s1163_s10 }
 0x7ae   :  { %69 = vperm.xlu0 %1105, %v34_v5   ;;  %656 = vrot.lane.b32.xlu1 %v644_v2, %s1165_s3 }
 0x81c   :  { %v651_v6 = vpop.permute.xlu0 %650  ;;  %v647_v49 = vpop.permute.xlu1 %646 }
 0x81d   :  { %v653_v50 = vmul.f32 %v651_v6, %v562_v38  ;;  %v649_v51 = vmul.f32 %v1127_v47, %v647_v49 }
 0x81f   :  { %v654_v52 = vadd.f32 %v653_v50, %v649_v51 }
 0x820   :  { %v657_v54 = vpop.permute.xlu1 %656 }
 0x821   :  { %1128 = vtanh.f32 %v654_v52 }
 0x829   :  { %v70_v56 = vpop.permute.xlu0 %69 }
 0x82a   :  { %v89_v57 = vmul.f32 %v1261_v7, %v70_v56 }
 0x82c   :  { %v104_v58 = vadd.f32 %v1267_v10, %v89_v57 }
 0x82e   :  { %v1129_v53 = vpop.eup %1128 }
 0x82f   :  { %v659_v55 = vmul.f32 %v1129_v53, %v657_v54 }
 0x831   :  { %1074 = vmatmul.mubr.msk.f32.vlgmr.msra.gmra.mxu0 %vm106_vm1, %v659_v55 }
 0x832   :  { %1095 = vmatprep.mubr.msk.f32.mxu0 %vm1161_vm0, %v1160_v1  ;;  %1088 = vmatpush3.msra.mxu0 %v847_v26 }
 0x833   :  { %1089 = vmatprep.subr.mxu0 %v1160_v1 }
 0x8f1   :  { %v729_v59 = vpop.f32.mrf.mxu0 }
 0x8f2   :  { %v733_v60 = vadd.f32 %v729_v59, %v104_v58 }
 0x8f3   :  { %v1075_v61 = vpop.f32.mrf.mxu0 }
 0x8f4   :  { %1130 = vtanh.f32 %v733_v60 }
 0x901   :  { %v1131_v62 = vpop.eup %1130 }
 0x902   :  { %v735_v63 = vmul.f32 0.5, %v1131_v62 }
 0x904   :  { %v736_v3 = vadd.f32 0.5, %v735_v63 }
 0x906   :  { %742 = vrot.lane.b32.xlu0 %v736_v3, %s1164_s12  ;;  %738 = vrot.lane.b32.xlu1 %v736_v3, %s1163_s10 }
 0x90a   :  { %74 = vperm.xlu0 %1105, %v35_v4   ;;  %748 = vrot.lane.b32.xlu1 %v736_v3, %s1165_s3 }
 0x978   :  { %v743_v8 = vpop.permute.xlu0 %742  ;;  %v739_v9 = vpop.permute.xlu1 %738 }
 0x979   :  { %v745_v11 = vmul.f32 %v743_v8, %v654_v52  ;;  %v741_v12 = vmul.f32 %v1131_v62, %v739_v9 }
 0x97b   :  { %v746_v13 = vadd.f32 %v745_v11, %v741_v12 }
 0x97c   :  { %v749_v15 = vpop.permute.xlu1 %748 }
 0x97d   :  { %1132 = vtanh.f32 %v746_v13 }
 0x985   :  { %v75_v17 = vpop.permute.xlu0 %74 }
 0x986   :  { %v90_v18 = vmul.f32 %v1261_v7, %v75_v17  ;;  %v846_v7 = vld [vmem:[%s1413_s4 + $0x10] sm:$0xff] }
 0x987   :  { %1090 = vmatpush3.msra.mxu0 %v846_v7 }
 0x988   :  { %v105_v19 = vadd.f32 %v1267_v10, %v90_v18  ;;  %v845_v10 = vld [vmem:[%s1413_s4 + $0x8] sm:$0xff]  ;;  %1091 = vmatprep.subr.mxu0 %v1160_v1  ;;  %s935_s4 = sshll.u32 %s1166_s9, 4  ;;  %s936_s4 = int_to_ptr.vmem [resolvable:$true] %s935_s4 }
 0x989   :  { %1092 = vmatpush3.msra.mxu0 %v845_v10  ;;  %p1143_p1 = scmp.lt.s32.totalorder %s936_s4, %s936_s4 }
 0x98a   :  { %v1133_v14 = vpop.eup %1132  ;;  %1093 = vmatprep.subr.mxu0 %v1160_v1 }
 0x98b   :  { %v751_v16 = vmul.f32 %v1133_v14, %v749_v15  ;;  %1094 = vmatpush3.msra.mxu0 %v844_v27 }
 0x98d   :  { %1085 = vmatmul.mubr.msk.f32.vlgmr.msra.gmra.mxu1 %vm106_vm1, %v751_v16 }
 0xa4d   :  { %v821_v20 = vpop.f32.mrf.mxu1 }
 0xa4e   :  { %v825_v21 = vadd.f32 %v821_v20, %v105_v19 }
 0xa4f   :  { %v1086_v22 = vpop.f32.mrf.mxu1 }
 0xa50   :  { %1134 = vtanh.f32 %v825_v21 }
 0xa5d   :  { %v1135_v23 = vpop.eup %1134 }
 0xa5e   :  { %v827_v24 = vmul.f32 0.5, %v1135_v23 }
 0xa60   :  { %v828_v25 = vadd.f32 0.5, %v827_v24 }
 0xa62   :  { %834 = vrot.lane.b32.xlu0 %v828_v25, %s1164_s12  ;;  %830 = vrot.lane.b32.xlu1 %v828_v25, %s1163_s10  ;;  %s1138_s10 = scalar_lea.vmem %s936_s4, 128 }
 0xa63   :  { %p1139_p0 = scmp.ne.s32.totalorder %s936_s4, %s1138_s10  ;;  %p1144_p2 = scmp.lt.s32.totalorder %s1138_s10, %s1138_s10 }
 0xa65   :  { %p1145_p3 = por %p1144_p2, %p1143_p1 }
 0xa66   :  { %840 = vrot.lane.b32.xlu1 %v828_v25, %s1165_s3 }
 0xa67   :  { %p1146_p4 = pnand %p1145_p3, %p1139_p0 }
 0xad4   :  { %v835_v28 = vpop.permute.xlu0 %834  ;;  %v831_v29 = vpop.permute.xlu1 %830 }
 0xad5   :  { %v837_v30 = vmul.f32 %v835_v28, %v746_v13  ;;  %v833_v31 = vmul.f32 %v1135_v23, %v831_v29 }
 0xad7   :  { %v838_v32 = vadd.f32 %v837_v30, %v833_v31 }
 0xad8   :  { %v841_v34 = vpop.permute.xlu1 %840 }
 0xad9   :  { %1136 = vtanh.f32 %v838_v32 }
 0xae6   :  { %v1137_v33 = vpop.eup %1136 }
 0xae7   :  { %v843_v35 = vmul.f32 %v1137_v33, %v841_v34 }
 0xae9   :  { %1096 = vmatmul.mubr.msk.f32.vlgmr.msra.gmra.mxu0 %vm106_vm1, %v843_v35 }
 0xba9   :  { %v924_v37 = vpop.f32.mrf.mxu0 }
 0xbaa   :  { %v925_v1 = vadd.f32 %v952_v36, %v924_v37 }
 0xbab   :  { %v1097_v38 = vpop.f32.mrf.mxu0 }
 0xbac   :  { %928 = vst [vmem:[#allocation2] sm:$0xff] %v925_v1 }
 0xbad   :  { %1149 = shalt.err (!%p1146_p4)
}
 0xbae   :  { %938 = dma.vmem_to_hbm [thread:$0]  %s936_s4, 128, %s1415_s6, [#allocation3]  }
 0xbaf   :  { %1158 = dma.done.wait [#allocation3], 128  }
 0xbb0   :  { %1159 = vsyncadd [#allocation3], 4294967168 }
 0xbb1   :  { %942 = vsyncpa [#allocation3], 1 }

</bundles_post_ra>
